<compile_context>
chip_gen: v7x
topology: tpu7x:2x2x1
jax: 0.10.0
libtpu: 0.0.40
codegen_flags: <defaults>
</compile_context>

<pallas_src>
import functools

import jax
import jax.numpy as jnp
from jax.experimental import pallas as pl
from jax.experimental.pallas import tpu as pltpu


def _round_up(x, m):
    return ((x + m - 1) // m) * m


def ffn_kernel(x_ref, w1_ref, b1_ref, w2_ref, b2_ref, o_ref, acc_ref):
    """One (row-tile, d_ff-chunk) step of relu(x @ W1 + b1) @ W2 + b2."""
    k = pl.program_id(1)

    # Fold the b2 add into the accumulator init (single VPU pass, hoisted).
    @pl.when(k == 0)
    def _():
        acc_ref[...] = jnp.broadcast_to(
            b2_ref[...].astype(jnp.float32), acc_ref.shape)

    # First matmul on this d_ff chunk; bias + ReLU epilogue in f32.
    h = jnp.dot(x_ref[...], w1_ref[...], preferred_element_type=jnp.float32)
    h = jnp.maximum(h + b1_ref[...].astype(jnp.float32), 0.0)

    # Second matmul: accumulate this chunk's contribution (f32 accumulator).
    # h is cast to the weight dtype (bf16 on v6e/v7x) — intentional precision choice.
    acc_ref[...] += jnp.dot(h.astype(w2_ref.dtype), w2_ref[...],
                            preferred_element_type=jnp.float32)

    @pl.when(k == pl.num_programs(1) - 1)
    def _():
        o_ref[...] = acc_ref[...].astype(o_ref.dtype)


@functools.partial(
    jax.jit, static_argnames=("block_rows", "ff_chunk", "compute_dtype"))
def positionwise_ffn(x, w1, b1, w2, b2, *, block_rows=256, ff_chunk=512,
                     compute_dtype=None):
    """x: (B, S, d_model) -> (B, S, d_model).

    block_rows: row tile (MXU rows); keep it a multiple of 128 on real sizes.
    ff_chunk:   d_ff reduction chunk (multiple of 128).
    compute_dtype: pass jnp.bfloat16 on v6e/v7x for full-rate MXU (f32 accumulate).
    """
    out_dtype = x.dtype
    if compute_dtype is not None:
        x = x.astype(compute_dtype)
        w1 = w1.astype(compute_dtype)
        w2 = w2.astype(compute_dtype)

    B, S, d_model = x.shape
    d_ff = w1.shape[1]
    N = B * S

    # Lane-dense / tile-aligned padded sizes.
    d_model_p = _round_up(d_model, 128)
    ff_chunk = min(ff_chunk, _round_up(d_ff, 128))
    d_ff_p = _round_up(d_ff, ff_chunk)
    tm = min(block_rows, _round_up(N, 8))
    N_p = _round_up(N, tm)

    x2 = jnp.pad(x.reshape(N, d_model),
                 ((0, N_p - N), (0, d_model_p - d_model)))
    w1_p = jnp.pad(w1, ((0, d_model_p - d_model), (0, d_ff_p - d_ff)))
    b1_p = jnp.pad(b1, (0, d_ff_p - d_ff)).reshape(1, d_ff_p)
    w2_p = jnp.pad(w2, ((0, d_ff_p - d_ff), (0, d_model_p - d_model)))
    b2_p = jnp.pad(b2, (0, d_model_p - d_model)).reshape(1, d_model_p)

    grid = (N_p // tm, d_ff_p // ff_chunk)

    itemsize = jnp.dtype(x2.dtype).itemsize
    cost = pl.CostEstimate(
        flops=4 * N_p * d_model_p * d_ff_p,          # two matmuls, 2 flops/MAC
        transcendentals=0,
        bytes_accessed=itemsize * (
            2 * N_p * d_model_p                      # x in + y out
            + grid[0] * (w1_p.size + w2_p.size)      # weight slabs per row tile
            + b1_p.size + b2_p.size),
    )

    out_p = pl.pallas_call(
        ffn_kernel,
        out_shape=jax.ShapeDtypeStruct((N_p, d_model_p), out_dtype),
        grid_spec=pltpu.PrefetchScalarGridSpec(
            num_scalar_prefetch=0,
            grid=grid,
            in_specs=[
                # row tile of the input, reused across the d_ff chunks
                pl.BlockSpec((tm, d_model_p), lambda i, k: (i, 0)),
                # weight / bias chunks along d_ff
                pl.BlockSpec((d_model_p, ff_chunk), lambda i, k: (0, k)),
                pl.BlockSpec((1, ff_chunk), lambda i, k: (0, k)),
                pl.BlockSpec((ff_chunk, d_model_p), lambda i, k: (k, 0)),
                pl.BlockSpec((1, d_model_p), lambda i, k: (0, 0)),
            ],
            out_specs=pl.BlockSpec((tm, d_model_p), lambda i, k: (i, 0)),
            scratch_shapes=[pltpu.VMEM((tm, d_model_p), jnp.float32)],
        ),
        compiler_params=pltpu.CompilerParams(
            # rows parallel (megacore on v7x), d_ff reduction arbitrary + last
            dimension_semantics=("parallel", "arbitrary"),
            vmem_limit_bytes=64 * 1024 * 1024,
        ),
        cost_estimate=cost,
    )(x2, w1_p, b1_p, w2_p, b2_p)

    return out_p[:N, :d_model].reshape(B, S, d_model)


def init_params(key, d_model, d_ff, dtype=jnp.float32):
    """nn.Linear-style init (uniform +-1/sqrt(fan_in)); weights transposed vs torch."""
    k1, k2, k3, k4 = jax.random.split(key, 4)
    bound1 = 1.0 / (d_model ** 0.5)
    bound2 = 1.0 / (d_ff ** 0.5)
    w1 = jax.random.uniform(k1, (d_model, d_ff), dtype, -bound1, bound1)
    b1 = jax.random.uniform(k2, (d_ff,), dtype, -bound1, bound1)
    w2 = jax.random.uniform(k3, (d_ff, d_model), dtype, -bound2, bound2)
    b2 = jax.random.uniform(k4, (d_model,), dtype, -bound2, bound2)
    return w1, b1, w2, b2


if __name__ == "__main__":
    key = jax.random.PRNGKey(0)
    kx, kp = jax.random.split(key)

    batch, seq, d_model, d_ff = 2, 8, 32, 64
    x = jax.random.normal(kx, (batch, seq, d_model), jnp.float32)
    w1, b1, w2, b2 = init_params(kp, d_model, d_ff)

    out = positionwise_ffn(x, w1, b1, w2, b2)
    out = jax.block_until_ready(out)

    # Pure-JAX reference (dropout is identity in eval mode).
    ref = jnp.maximum(x.reshape(-1, d_model) @ w1 + b1, 0.0) @ w2 + b2
    ref = ref.reshape(batch, seq, d_model)
    assert out.shape == (batch, seq, d_model)
    assert jnp.allclose(out, ref, atol=1e-5, rtol=1e-5), "mismatch vs reference"

    print("KERNEL_OK")
</pallas_src>

<mosaic_0001>
module attributes {stable_mosaic.version = 11 : i64} {
  func.func @ffn_kernel(%arg0: i32, %arg1: i32, %arg2: memref<16x128xf32, #tpu.memory_space<vmem>>, %arg3: memref<128x128xf32, #tpu.memory_space<vmem>>, %arg4: memref<1x128xf32, #tpu.memory_space<vmem>>, %arg5: memref<128x128xf32, #tpu.memory_space<vmem>>, %arg6: memref<1x128xf32, #tpu.memory_space<vmem>>, %arg7: memref<16x128xf32, #tpu.memory_space<vmem>>, %arg8: memref<16x128xf32, #tpu.memory_space<vmem>>) attributes {dimension_semantics = [#tpu.dimension_semantics<parallel>, #tpu.dimension_semantics<arbitrary>], iteration_bounds = array<i64: 1, 1>, scalar_prefetch = 0 : i64, scratch_operands = 1 : i64, tpu.core_type = #tpu.core_type<tc>, window_params = [{transform_indices = @transform_0, window_bounds = array<i64: 16, 128>}, {transform_indices = @transform_1, window_bounds = array<i64: 128, 128>}, {transform_indices = @transform_2, window_bounds = array<i64: 1, 128>}, {transform_indices = @transform_3, window_bounds = array<i64: 128, 128>}, {pipeline_mode = #tpu.pipeline_mode<synchronous>, transform_indices = @transform_4, window_bounds = array<i64: 1, 128>}, {transform_indices = @transform_5, window_bounds = array<i64: 16, 128>}]} {
    %c0_i32 = arith.constant 0 : i32
    %0 = arith.cmpi eq, %arg1, %c0_i32 : i32
    %1 = arith.extui %0 : i1 to i32
    %c0_i32_0 = arith.constant 0 : i32
    %2 = arith.cmpi ne, %1, %c0_i32_0 : i32
    scf.if %2 {
      %c0_16 = arith.constant 0 : index
      %c0_17 = arith.constant 0 : index
      %19 = vector.load %arg6[%c0_16, %c0_17] : memref<1x128xf32, #tpu.memory_space<vmem>>, vector<1x128xf32>
      %20 = vector.shape_cast %19 : vector<1x128xf32> to vector<1x128xf32>
      %21 = vector.broadcast %20 : vector<1x128xf32> to vector<16x128xf32>
      %c0_18 = arith.constant 0 : index
      %c0_19 = arith.constant 0 : index
      %22 = vector.load %arg8[%c0_18, %c0_19] : memref<16x128xf32, #tpu.memory_space<vmem>>, vector<16x128xf32>
      tpu.vector_store %arg8[%c0_18, %c0_19], %21 {strides = array<i32>} : memref<16x128xf32, #tpu.memory_space<vmem>>, vector<16x128xf32>,
    } else {
    }
    %c0 = arith.constant 0 : index
    %c0_1 = arith.constant 0 : index
    %3 = vector.load %arg2[%c0, %c0_1] : memref<16x128xf32, #tpu.memory_space<vmem>>, vector<16x128xf32>
    %c0_2 = arith.constant 0 : index
    %c0_3 = arith.constant 0 : index
    %4 = vector.load %arg3[%c0_2, %c0_3] : memref<128x128xf32, #tpu.memory_space<vmem>>, vector<128x128xf32>
    %cst = arith.constant dense<0.000000e+00> : vector<16x128xf32>
    %5 = tpu.matmul %3, %4, %cst {dimension_numbers = #tpu.dot_dimension_numbers<[1], [0], [0], [1], [0, 0, 1, 1], [], []>} : vector<16x128xf32>, vector<128x128xf32>, vector<16x128xf32> -> vector<16x128xf32>
    %c0_4 = arith.constant 0 : index
    %c0_5 = arith.constant 0 : index
    %6 = vector.load %arg4[%c0_4, %c0_5] : memref<1x128xf32, #tpu.memory_space<vmem>>, vector<1x128xf32>
    %7 = vector.broadcast %6 : vector<1x128xf32> to vector<16x128xf32>
    %8 = arith.addf %5, %7 : vector<16x128xf32>
    %cst_6 = arith.constant 0.000000e+00 : f32
    %9 = vector.broadcast %cst_6 : f32 to vector<16x128xf32>
    %10 = arith.maximumf %8, %9 : vector<16x128xf32>
    %c0_7 = arith.constant 0 : index
    %c0_8 = arith.constant 0 : index
    %11 = vector.load %arg8[%c0_7, %c0_8] : memref<16x128xf32, #tpu.memory_space<vmem>>, vector<16x128xf32>
    %c0_9 = arith.constant 0 : index
    %c0_10 = arith.constant 0 : index
    %12 = vector.load %arg5[%c0_9, %c0_10] : memref<128x128xf32, #tpu.memory_space<vmem>>, vector<128x128xf32>
    %cst_11 = arith.constant dense<0.000000e+00> : vector<16x128xf32>
    %13 = tpu.matmul %10, %12, %cst_11 {dimension_numbers = #tpu.dot_dimension_numbers<[1], [0], [0], [1], [0, 0, 1, 1], [], []>} : vector<16x128xf32>, vector<128x128xf32>, vector<16x128xf32> -> vector<16x128xf32>
    %14 = arith.addf %11, %13 : vector<16x128xf32>
    %c0_12 = arith.constant 0 : index
    %c0_13 = arith.constant 0 : index
    %15 = vector.load %arg8[%c0_12, %c0_13] : memref<16x128xf32, #tpu.memory_space<vmem>>, vector<16x128xf32>
    tpu.vector_store %arg8[%c0_12, %c0_13], %14 {strides = array<i32>} : memref<16x128xf32, #tpu.memory_space<vmem>>, vector<16x128xf32>,
    %c0_i32_14 = arith.constant 0 : i32
    %16 = arith.cmpi eq, %arg1, %c0_i32_14 : i32
    %17 = arith.extui %16 : i1 to i32
    %c0_i32_15 = arith.constant 0 : i32
    %18 = arith.cmpi ne, %17, %c0_i32_15 : i32
    scf.if %18 {
      %c0_16 = arith.constant 0 : index
      %c0_17 = arith.constant 0 : index
      %19 = vector.load %arg8[%c0_16, %c0_17] : memref<16x128xf32, #tpu.memory_space<vmem>>, vector<16x128xf32>
      %c0_18 = arith.constant 0 : index
      %c0_19 = arith.constant 0 : index
      %20 = vector.load %arg7[%c0_18, %c0_19] : memref<16x128xf32, #tpu.memory_space<vmem>>, vector<16x128xf32>
      tpu.vector_store %arg7[%c0_18, %c0_19], %19 {strides = array<i32>} : memref<16x128xf32, #tpu.memory_space<vmem>>, vector<16x128xf32>,
    } else {
    }
    return
  }
  func.func @transform_0(%arg0: i32, %arg1: i32) -> (i32, i32) {
    %c0_i32 = arith.constant 0 : i32
    %c0_i32_0 = arith.constant 0 : i32
    return %arg0, %c0_i32 : i32, i32
  }
  func.func @transform_1(%arg0: i32, %arg1: i32) -> (i32, i32) {
    %c0_i32 = arith.constant 0 : i32
    %c0_i32_0 = arith.constant 0 : i32
    return %c0_i32, %arg1 : i32, i32
  }
  func.func @transform_2(%arg0: i32, %arg1: i32) -> (i32, i32) {
    %c0_i32 = arith.constant 0 : i32
    %c0_i32_0 = arith.constant 0 : i32
    return %c0_i32, %arg1 : i32, i32
  }
  func.func @transform_3(%arg0: i32, %arg1: i32) -> (i32, i32) {
    %c0_i32 = arith.constant 0 : i32
    %c0_i32_0 = arith.constant 0 : i32
    return %arg1, %c0_i32 : i32, i32
  }
  func.func @transform_4(%arg0: i32, %arg1: i32) -> (i32, i32) {
    %c0_i32 = arith.constant 0 : i32
    %c0_i32_0 = arith.constant 0 : i32
    %c0_i32_1 = arith.constant 0 : i32
    return %c0_i32, %c0_i32_0 : i32, i32
  }
  func.func @transform_5(%arg0: i32, %arg1: i32) -> (i32, i32) {
    %c0_i32 = arith.constant 0 : i32
    %c0_i32_0 = arith.constant 0 : i32
    return %arg0, %c0_i32 : i32, i32
  }
}

</mosaic_0001>

<bundles_post_ra>
// kernel: positionwise_ffn.1
= control target key start
LH: loop header
LB: loop body
LE: loop exit
PB: predicated region body
PF: predicated region fallthrough
CT: control target
= control target key end

     0   :  { %10 = vsyncpa [#allocation4], 0  ;;  %s772_s0 = inlined_call_operand.hbm [shape: f32[16,128], index: 0, kind: input, shape index: {}]   ;;  %s773_s1 = inlined_call_operand.hbm [shape: f32[128,128], index: 1, kind: input, shape index: {}]   ;;  %s774_s2 = inlined_call_operand.hbm [shape: f32[1,128], index: 2, kind: input, shape index: {}]   ;;  %s775_s3 = inlined_call_operand.hbm [shape: f32[128,128], index: 3, kind: input, shape index: {}]   ;;  %s776_s4 = inlined_call_operand.hbm [shape: f32[1,128], index: 4, kind: input, shape index: {}]   ;;  %s777_s5 = inlined_call_operand.hbm [shape: f32[16,128], index: 5, kind: output, shape index: {}]  }
   0x1   :  { %11 = vsyncpa [#allocation7], 0 }
   0x2   :  { %12 = vsyncpa [#allocation10], 0 }
   0x3   :  { %13 = vsyncpa [#allocation5], 0  ;;  %s643_s18 = smov [#allocation6]   ;;  %s644_s20 = smov [#allocation9]  }
   0x4   :  { %s31_s19 = sshll.u32 %s643_s18, 4  ;;  %s53_s21 = sshll.u32 %s644_s20, 4  ;;  %s32_s19 = int_to_ptr.vmem [resolvable:$true] %s31_s19  ;;  %s681_s21 = int_to_ptr.vmem [resolvable:$true] %s53_s21 }
   0x5   :  { %s503_s24 = scalar_lea.hbm %s773_s1, 2048 }
   0x6   :  { %p504_p0 = scmp.ne.s32.totalorder %s773_s1, %s503_s24  ;;  %p507_p1 = scmp.lt.u32.totalorder %s503_s24, %s773_s1 }
   0x8   :  { %p509_p2 = pnand %p507_p1, %p504_p0 }
   0xa   :  { %512 = shalt.err (!%p509_p2)
}
   0xb   :  { %s513_s29 = scalar_lea.vmem %s32_s19, 2048  ;;  %p518_p4 = scmp.lt.s32.totalorder %s32_s19, %s32_s19 }
   0xc   :  { %p514_p3 = scmp.ne.s32.totalorder %s32_s19, %s513_s29  ;;  %p519_p5 = scmp.lt.s32.totalorder %s513_s29, %s513_s29 }
   0xe   :  { %p520_p6 = por %p519_p5, %p518_p4 }
  0x10   :  { %p521_p7 = pnand %p520_p6, %p514_p3 }
  0x12   :  { %524 = shalt.err (!%p521_p7)
}
  0x13   :  { %s645_s30 = smov 128   ;;  %s646_s6 = smov 8  }
  0x14   :  { %37 = dma.hbm_to_vmem [thread:$0]  %s773_s1, 2048, %s32_s19, [#allocation7], %s645_s30, %s645_s30, %s646_s6  }
  0x15   :  { %s525_s11 = scalar_lea.hbm %s775_s3, 2048 }
  0x16   :  { %p526_p8 = scmp.ne.s32.totalorder %s775_s3, %s525_s11  ;;  %p529_p9 = scmp.lt.u32.totalorder %s525_s11, %s775_s3 }
  0x18   :  { %p531_p10 = pnand %p529_p9, %p526_p8 }
  0x1a   :  { %534 = shalt.err (!%p531_p10)
}
  0x1b   :  { %s535_s16 = scalar_lea.vmem %s681_s21, 2048  ;;  %p540_p12 = scmp.lt.s32.totalorder %s681_s21, %s681_s21 }
  0x1c   :  { %p536_p11 = scmp.ne.s32.totalorder %s681_s21, %s535_s16  ;;  %p541_p13 = scmp.lt.s32.totalorder %s535_s16, %s535_s16 }
  0x1e   :  { %p542_p0 = por %p541_p13, %p540_p12 }
  0x20   :  { %p543_p1 = pnand %p542_p0, %p536_p11 }
  0x22   :  { %546 = shalt.err (!%p543_p1)
}
  0x23   :  { %59 = dma.hbm_to_vmem [thread:$0]  %s775_s3, 2048, %s681_s21, [#allocation10], %s645_s30, %s645_s30, %s646_s6  }
  0x24   :  { %s647_s18 = smov [#allocation3]   ;;  %s648_s20 = smov [#allocation8]  }
  0x25   :  { %s19_s19 = sshll.u32 %s647_s18, 4  ;;  %s44_s22 = sshll.u32 %s648_s20, 4  ;;  %s20_s19 = int_to_ptr.vmem [resolvable:$true] %s19_s19  ;;  %s45_s22 = int_to_ptr.vmem [resolvable:$true] %s44_s22 }
  0x26   :  { %s547_s25 = scalar_lea.hbm %s772_s0, 256 }
  0x27   :  { %p548_p2 = scmp.ne.s32.totalorder %s772_s0, %s547_s25  ;;  %p551_p3 = scmp.lt.u32.totalorder %s547_s25, %s772_s0 }
  0x29   :  { %p553_p4 = pnand %p551_p3, %p548_p2 }
  0x2b   :  { %556 = shalt.err (!%p553_p4)
}
  0x2c   :  { %s557_s3 = scalar_lea.vmem %s20_s19, 256  ;;  %p562_p6 = scmp.lt.s32.totalorder %s20_s19, %s20_s19 }
  0x2d   :  { %p558_p5 = scmp.ne.s32.totalorder %s20_s19, %s557_s3  ;;  %p563_p7 = scmp.lt.s32.totalorder %s557_s3, %s557_s3 }
  0x2f   :  { %p564_p8 = por %p563_p7, %p562_p6 }
  0x31   :  { %p565_p9 = pnand %p564_p8, %p558_p5 }
  0x33   :  { %568 = shalt.err (!%p565_p9)
}
  0x34   :  { %25 = dma.hbm_to_vmem [thread:$0]  %s772_s0, 256, %s20_s19, [#allocation4], %s645_s30, %s645_s30, %s646_s6  }
  0x35   :  { %s569_s10 = scalar_lea.hbm %s774_s2, 16 }
  0x36   :  { %p570_p10 = scmp.ne.s32.totalorder %s774_s2, %s569_s10  ;;  %p573_p11 = scmp.lt.u32.totalorder %s569_s10, %s774_s2 }
  0x38   :  { %p575_p12 = pnand %p573_p11, %p570_p10 }
  0x3a   :  { %578 = shalt.err (!%p575_p12)
}
  0x3b   :  { %s579_s15 = scalar_lea.vmem %s45_s22, 16  ;;  %s583_s16 = scalar_lea.vmem %s45_s22, 32 }
  0x3c   :  { %p580_p13 = scmp.ne.s32.totalorder %s45_s22, %s579_s15  ;;  %p584_p0 = scmp.lt.s32.totalorder %s45_s22, %s45_s22 }
  0x3d   :  { %p585_p1 = scmp.lt.s32.totalorder %s583_s16, %s579_s15 }
  0x3f   :  { %p586_p2 = por %p585_p1, %p584_p0 }
  0x41   :  { %p587_p3 = pnand %p586_p2, %p580_p13 }
  0x43   :  { %590 = shalt.err (!%p587_p3)
}
  0x44   :  { %47 = dma.hbm_to_vmem [thread:$0]  %s774_s2, 16, %s45_s22, [#allocation7]  }
  0x45   :  { %s649_s17 = smov [#allocation11]   ;;  %s591_s23 = scalar_lea.hbm %s776_s4, 16 }
  0x46   :  { %s66_s18 = sshll.u32 %s649_s17, 4  ;;  %p592_p4 = scmp.ne.s32.totalorder %s776_s4, %s591_s23  ;;  %s67_s18 = int_to_ptr.vmem [resolvable:$true] %s66_s18 }
  0x47   :  { %p595_p5 = scmp.lt.u32.totalorder %s591_s23, %s776_s4 }
  0x49   :  { %p597_p6 = pnand %p595_p5, %p592_p4 }
  0x4b   :  { %600 = shalt.err (!%p597_p6)
}
  0x4c   :  { %s601_s28 = scalar_lea.vmem %s67_s18, 16  ;;  %s605_s2 = scalar_lea.vmem %s67_s18, 32 }
  0x4d   :  { %p602_p7 = scmp.ne.s32.totalorder %s67_s18, %s601_s28  ;;  %p606_p8 = scmp.lt.s32.totalorder %s67_s18, %s67_s18 }
  0x4e   :  { %p607_p9 = scmp.lt.s32.totalorder %s605_s2, %s601_s28 }
  0x50   :  { %p608_p10 = por %p607_p9, %p606_p8 }
  0x52   :  { %p609_p11 = pnand %p608_p10, %p602_p7 }
  0x54   :  { %612 = shalt.err (!%p609_p11)
}
  0x55   :  { %69 = dma.hbm_to_vmem [thread:$0]  %s776_s4, 16, %s67_s18, [#allocation10]  }
  0x56   :  { %635 = dma.done.wait [#allocation4], 256  }
  0x57   :  { %636 = vsyncadd [#allocation4], 4294967040 }
  0x58   :  { %637 = dma.done.wait [#allocation7], 2064  }
  0x59   :  { %638 = vsyncadd [#allocation7], 4294965232 }
  0x5a   :  { %639 = dma.done.wait [#allocation10], 2064  }
  0x5b   :  { %640 = vsyncadd [#allocation10], 4294965232  ;;  %v100_v0 = vld [vmem:[#allocation6] sm:$0xff]  ;;  %v101_v1 = vld [vmem:[#allocation6 + $0x8] sm:$0xff]  ;;  %s650_s4 = smov [#allocation12]  }
  0x5c   :  { %v102_v2 = vld [vmem:[#allocation6 + $0x10] sm:$0xff]  ;;  %v431_v3 = vpack.c.bf16 %v101_v1, %v100_v0  ;;  %v103_v4 = vld [vmem:[#allocation6 + $0x18] sm:$0xff]  ;;  %v104_v6 = vld [vmem:[#allocation6 + $0x20] sm:$0xff]  ;;  %s309_s3 = sshll.u32 %s650_s4, 4  ;;  %s310_s3 = int_to_ptr.vmem [resolvable:$true] %s309_s3 }
  0x5d   :  { %v435_v5 = vpack.c.bf16 %v103_v4, %v102_v2  ;;  %v105_v7 = vld [vmem:[#allocation6 + $0x28] sm:$0xff]  ;;  %v106_v9 = vld [vmem:[#allocation6 + $0x30] sm:$0xff]  ;;  %v107_v10 = vld [vmem:[#allocation6 + $0x38] sm:$0xff]  ;;  %s613_s21 = scalar_lea.vmem %s310_s3, 256  ;;  %p618_p13 = scmp.lt.s32.totalorder %s310_s3, %s310_s3 }
  0x5e   :  { %432 = vmatprep.subr.bf16.mxu0 %v431_v3  ;;  %v439_v8 = vpack.c.bf16 %v105_v7, %v104_v6  ;;  %v98_v11 = vld [vmem:[#allocation3] sm:$0xff]  ;;  %v202_v12 = vld [vmem:[#allocation9] sm:$0xff]  ;;  %v205_v16 = vld [vmem:[#allocation9 + $0x18] sm:$0xff]  ;;  %v443_v20 = vpack.c.bf16 %v107_v10, %v106_v9  ;;  %p614_p12 = scmp.ne.s32.totalorder %s310_s3, %s613_s21  ;;  %p619_p0 = scmp.lt.s32.totalorder %s613_s21, %s613_s21 }
  0x5f   :  { %434 = vmatpush3.bf16.msra.mxu0 %v431_v3  ;;  %393 = vmatprep.mubr.f32.mxu0 %v98_v11  ;;  %v203_v13 = vld [vmem:[#allocation9 + $0x8] sm:$0xff]  ;;  %v204_v14 = vld [vmem:[#allocation9 + $0x10] sm:$0xff]  ;;  %v206_v18 = vld [vmem:[#allocation9 + $0x20] sm:$0xff] }
  0x60   :  { %436 = vmatprep.subr.bf16.mxu0 %v435_v5  ;;  %v463_v15 = vpack.c.bf16 %v203_v13, %v202_v12  ;;  %v467_v17 = vpack.c.bf16 %v205_v16, %v204_v14  ;;  %v207_v19 = vld [vmem:[#allocation9 + $0x28] sm:$0xff]  ;;  %v108_v21 = vld [vmem:[#allocation6 + $0x40] sm:$0xff]  ;;  %v208_v24 = vld [vmem:[#allocation9 + $0x30] sm:$0xff]  ;;  %p620_p1 = por %p619_p0, %p618_p13 }
  0x61   :  { %v109_v22 = vld [vmem:[#allocation6 + $0x48] sm:$0xff]  ;;  %v471_v23 = vpack.c.bf16 %v207_v19, %v206_v18  ;;  %v209_v25 = vld [vmem:[#allocation9 + $0x38] sm:$0xff]  ;;  %v110_v27 = vld [vmem:[#allocation6 + $0x50] sm:$0xff] }
  0x62   :  { %464 = vmatprep.subr.bf16.mxu1 %v463_v15  ;;  %v447_v26 = vpack.c.bf16 %v109_v22, %v108_v21  ;;  %v111_v28 = vld [vmem:[#allocation6 + $0x58] sm:$0xff]  ;;  %v475_v29 = vpack.c.bf16 %v209_v25, %v208_v24  ;;  %v210_v30 = vld [vmem:[#allocation9 + $0x40] sm:$0xff]  ;;  %v211_v31 = vld [vmem:[#allocation9 + $0x48] sm:$0xff]  ;;  %p621_p2 = pnand %p620_p1, %p614_p12 }
  0x63   :  { %438 = vmatpush3.bf16.msra.mxu0 %v435_v5  ;;  %466 = vmatpush3.bf16.msra.mxu1 %v463_v15  ;;  %v451_v32 = vpack.c.bf16 %v111_v28, %v110_v27  ;;  %v112_v33 = vld [vmem:[#allocation6 + $0x60] sm:$0xff]  ;;  %v113_v34 = vld [vmem:[#allocation6 + $0x68] sm:$0xff]  ;;  %v479_v35 = vpack.c.bf16 %v211_v31, %v210_v30  ;;  %v212_v36 = vld [vmem:[#allocation9 + $0x50] sm:$0xff] }
  0x64   :  { %440 = vmatprep.subr.bf16.mxu0 %v439_v8  ;;  %468 = vmatprep.subr.bf16.mxu1 %v467_v17  ;;  %v213_v37 = vld [vmem:[#allocation9 + $0x58] sm:$0xff]  ;;  %v455_v38 = vpack.c.bf16 %v113_v34, %v112_v33  ;;  %v114_v39 = vld [vmem:[#allocation6 + $0x70] sm:$0xff]  ;;  %v214_v42 = vld [vmem:[#allocation9 + $0x60] sm:$0xff] }
  0x65   :  { %v115_v40 = vld [vmem:[#allocation6 + $0x78] sm:$0xff]  ;;  %v483_v41 = vpack.c.bf16 %v213_v37, %v212_v36  ;;  %v215_v43 = vld [vmem:[#allocation9 + $0x68] sm:$0xff]  ;;  %v324_v50 = vld [vmem:[#allocation8] ss:$0 sm:$0xff] }
  0x66   :  { %v459_v44 = vpack.c.bf16 %v115_v40, %v114_v39  ;;  %v487_v45 = vpack.c.bf16 %v215_v43, %v214_v42  ;;  %v99_v46 = vld [vmem:[#allocation3 + $0x8] sm:$0xff]  ;;  %v323_v57 = vld [vmem:[#allocation11] ss:$0 sm:$0xff] }
  0x67   :  { %442 = vmatpush3.bf16.msra.mxu0 %v439_v8  ;;  %470 = vmatpush3.bf16.msra.mxu1 %v467_v17  ;;  %v216_v47 = vld [vmem:[#allocation9 + $0x70] sm:$0xff]  ;;  %v217_v48 = vld [vmem:[#allocation9 + $0x78] sm:$0xff] }
  0x68   :  { %444 = vmatprep.subr.bf16.mxu0 %v443_v20  ;;  %472 = vmatprep.subr.bf16.mxu1 %v471_v23  ;;  %v491_v49 = vpack.c.bf16 %v217_v48, %v216_v47 }
  0x6b   :  { %446 = vmatpush3.bf16.msra.mxu0 %v443_v20  ;;  %474 = vmatpush3.bf16.msra.mxu1 %v471_v23 }
  0x6c   :  { %448 = vmatprep.subr.bf16.mxu0 %v447_v26  ;;  %476 = vmatprep.subr.bf16.mxu1 %v475_v29 }
  0x6f   :  { %450 = vmatpush3.bf16.msra.mxu0 %v447_v26  ;;  %478 = vmatpush3.bf16.msra.mxu1 %v475_v29 }
  0x70   :  { %452 = vmatprep.subr.bf16.mxu0 %v451_v32  ;;  %480 = vmatprep.subr.bf16.mxu1 %v479_v35 }
  0x73   :  { %454 = vmatpush3.bf16.msra.mxu0 %v451_v32  ;;  %482 = vmatpush3.bf16.msra.mxu1 %v479_v35 }
  0x74   :  { %456 = vmatprep.subr.bf16.mxu0 %v455_v38  ;;  %484 = vmatprep.subr.bf16.mxu1 %v483_v41 }
  0x77   :  { %458 = vmatpush3.bf16.msra.mxu0 %v455_v38  ;;  %486 = vmatpush3.bf16.msra.mxu1 %v483_v41 }
  0x78   :  { %460 = vmatprep.subr.bf16.mxu0 %v459_v44  ;;  %488 = vmatprep.subr.bf16.mxu1 %v487_v45 }
  0x7b   :  { %462 = vmatpush3.bf16.msra.mxu0 %v459_v44  ;;  %490 = vmatpush3.bf16.msra.mxu1 %v487_v45 }
  0x7c   :  { %492 = vmatprep.subr.bf16.mxu1 %v491_v49 }
  0x7e   :  { %394 = vmatmul.mubr.f32.vlgmr.msra.gmra.mrb[0].mxu0 %v99_v46 }
  0x7f   :  { %494 = vmatpush3.bf16.msra.mxu1 %v491_v49 }
 0x151   :  { %v395_v51 = vpop.f32.mrb[0].mxu0 }
 0x152   :  { %v195_v52 = vadd.f32 %v395_v51, %v324_v50  ;;  %v189_v53 = vpop.f32.mrb[1].mxu0 }
 0x153   :  { %v190_v54 = vadd.f32 %v324_v50, %v189_v53 }
 0x154   :  { %v199_v56 = vmax.f32 %v195_v52, 0.0 }
 0x155   :  { %v198_v55 = vmax.f32 %v190_v54, 0.0 }
 0x157   :  { %428 = vmatprep.mubr.f32.mxu1 %v198_v55 }
 0x158   :  { %429 = vmatmul.mubr.f32.vlgmr.msra.gmra.mrb[0].mxu1 %v199_v56 }
 0x22b   :  { %v430_v58 = vpop.f32.mrb[0].mxu1 }
 0x22c   :  { %v294_v59 = vadd.f32 %v430_v58, %v323_v57  ;;  %v284_v60 = vpop.f32.mrb[1].mxu1 }
 0x22d   :  { %v293_v61 = vadd.f32 %v323_v57, %v284_v60 }
 0x22e   :  { %303 = vst [vmem:[#allocation12 + $0x8] sm:$0xff] %v294_v59 }
 0x22f   :  { %302 = vst [vmem:[#allocation12] sm:$0xff] %v293_v61 }
 0x230   :  { %624 = shalt.err (!%p621_p2)
}
 0x231   :  { %s625_s9 = scalar_lea.hbm %s777_s5, 256 }
 0x232   :  { %p626_p3 = scmp.ne.s32.totalorder %s777_s5, %s625_s9  ;;  %p629_p4 = scmp.lt.u32.totalorder %s625_s9, %s777_s5 }
 0x234   :  { %p631_p5 = pnand %p629_p4, %p626_p3 }
 0x236   :  { %634 = shalt.err (!%p631_p5)
}
 0x237   :  { %315 = dma.vmem_to_hbm [thread:$0]  %s310_s3, 256, %s777_s5, [#allocation5], %s645_s30, %s645_s30, %s646_s6  }
 0x238   :  { %641 = dma.done.wait [#allocation5], 256  }
 0x239   :  { %642 = vsyncadd [#allocation5], 4294967040 }
 0x23a   :  { %319 = vsyncpa [#allocation4], 1 }
 0x23b   :  { %320 = vsyncpa [#allocation7], 1 }
 0x23c   :  { %321 = vsyncpa [#allocation10], 1 }
 0x23d   :  { %322 = vsyncpa [#allocation5], 1 }

</bundles_post_ra>
